<compile_context>
chip_gen: v5e
topology: v5e:2x2
jax: 0.10.0
libtpu: 0.0.40
codegen_flags: <defaults>
</compile_context>

<pallas_src>
import functools

import jax
import jax.numpy as jnp
from jax import lax
from jax.experimental import pallas as pl
from jax.experimental.pallas import tpu as pltpu

LANE = 128          # lane width
CHUNK = 1024        # lanes per in-kernel chunk: (32, 1024) f32 hidden = 32 vregs


def _round_up(v, m):
    return -(-v // m) * m


def _mlp_kernel(x_ref, w1_ref, b1_ref, w2t_ref, b2_ref, o_ref, *, chunk, nchunks):
    # x_ref:  (3, TILE)   w1_ref: (32, 3)   b1_ref: (32, 1)
    # w2t_ref:(1, 32)     b2_ref: (1, 1) in SMEM      o_ref: (1, TILE)
    w1 = w1_ref[...]        # (32, 3)  VMEM-resident
    b1 = b1_ref[...]        # (32, 1)
    w2t = w2t_ref[...]      # (1, 32)
    b2 = b2_ref[0, 0]       # scalar

    def compute(c):
        start = pl.multiple_of(c * chunk, chunk)
        xc = x_ref[:, pl.ds(start, chunk)]                       # (3, chunk)
        # Layer 1 on the MXU (K=3 is padded by Mosaic; MXU has huge slack here).
        h = jnp.dot(w1, xc, preferred_element_type=jnp.float32,
                    precision=lax.Precision.HIGHEST)             # (32, chunk)
        h = jnp.maximum(h + b1, 0.0)                             # bias + ReLU (VPU)
        # Layer 2 on the MXU: (1,32) @ (32, chunk) -> (1, chunk).
        y = jnp.dot(w2t, h, preferred_element_type=jnp.float32,
                    precision=lax.Precision.HIGHEST)
        o_ref[:, pl.ds(start, chunk)] = (y + b2).astype(o_ref.dtype)

    if nchunks == 1:
        compute(0)
    else:
        def body(c, carry):
            compute(c)
            return carry
        lax.fori_loop(0, nchunks, body, 0, unroll=min(nchunks, 8))


def simple_chess_net(x, w1, b1, w2, b2, *, tb=131072):
    """Forward pass of Linear(3,32) -> ReLU -> Linear(32,1).

    x : (B, 3) float32
    w1: (3, 32)  b1: (32,)  w2: (32, 1)  b2: (1,)   (stored (in, out))
    Returns (B, 1) float32.
    """
    B = x.shape[0]
    b128 = _round_up(B, LANE)

    # Tile selection: multiple of the in-kernel chunk, capped by the batch and
    # by ~half the batch so grid >= 2 (lets v7x megacore split batch tiles).
    if b128 <= CHUNK:
        tile = b128
        chunk = b128
    else:
        whole = _round_up(b128, CHUNK)
        half = max(CHUNK, (b128 // 2) // CHUNK * CHUNK)
        tile = max(CHUNK, min(tb, whole, half) // CHUNK * CHUNK)
        chunk = CHUNK
    nchunks = tile // chunk
    grid = pl.cdiv(B, tile)

    # Lane-dense transposed layout (batch on the 128-lane axis).  No padding:
    # Pallas clamps the partial tail tile on both read and writeback.
    x_t = x.astype(jnp.float32).T                               # (3, B)
    w1_k = w1.astype(jnp.float32).T                             # (32, 3) out-major
    b1_k = jnp.reshape(b1, (32, 1)).astype(jnp.float32)
    w2t_k = jnp.reshape(w2, (1, 32)).astype(jnp.float32)
    b2_k = jnp.reshape(b2, (1, 1)).astype(jnp.float32)

    out = pl.pallas_call(
        functools.partial(_mlp_kernel, chunk=chunk, nchunks=nchunks),
        out_shape=jax.ShapeDtypeStruct((1, B), jnp.float32),
        grid=(grid,),
        in_specs=[
            pl.BlockSpec((3, tile), lambda i: (0, i)),            # x: streamed per tile
            pl.BlockSpec((32, 3), lambda i: (0, 0)),              # w1: VMEM-resident
            pl.BlockSpec((32, 1), lambda i: (0, 0)),              # b1: VMEM-resident
            pl.BlockSpec((1, 32), lambda i: (0, 0)),              # w2^T: VMEM-resident
            pl.BlockSpec(memory_space=pltpu.MemorySpace.SMEM),    # b2: scalar in SMEM
        ],
        out_specs=pl.BlockSpec((1, tile), lambda i: (0, i)),      # lane-dense output
        compiler_params=pltpu.CompilerParams(
            dimension_semantics=("parallel",),                    # v7x: 2 TCs share batch
            vmem_limit_bytes=32 * 1024 * 1024,                    # fits v5e/v6e/v7x
        ),
    )(x_t, w1_k, b1_k, w2t_k, b2_k)

    return out.reshape(B, 1)


def init_params(key):
    # PyTorch nn.Linear default init: U(-1/sqrt(fan_in), +1/sqrt(fan_in)).
    k1, k2, k3, k4 = jax.random.split(key, 4)
    bound1 = 1.0 / jnp.sqrt(3.0)
    bound2 = 1.0 / jnp.sqrt(32.0)
    w1 = jax.random.uniform(k1, (3, 32), jnp.float32, -bound1, bound1)
    b1 = jax.random.uniform(k2, (32,), jnp.float32, -bound1, bound1)
    w2 = jax.random.uniform(k3, (32, 1), jnp.float32, -bound2, bound2)
    b2 = jax.random.uniform(k4, (1,), jnp.float32, -bound2, bound2)
    return w1, b1, w2, b2


if __name__ == "__main__":
    key = jax.random.PRNGKey(0)
    kx, kp, kx2 = jax.random.split(key, 3)
    w1, b1, w2, b2 = init_params(kp)

    def ref_fn(xv):
        return jnp.maximum(xv @ w1 + b1[None, :], 0.0) @ w2 + b2[None, :]

    # Small demo batch (module spec: Linear(3,32) -> ReLU -> Linear(32,1)).
    B = 8
    x = jax.random.normal(kx, (B, 3), jnp.float32)
    out = simple_chess_net(x, w1, b1, w2, b2)
    jax.block_until_ready(out)
    assert out.shape == (B, 1)
    assert jnp.allclose(out, ref_fn(x), atol=1e-5, rtol=1e-5)

    # Secondary check: multi-step grid, in-kernel chunk loop, partial tail tile
    # (B=5000 -> tile=2048, grid=3, 2 chunks per tile).
    B2 = 5000
    x2 = jax.random.normal(kx2, (B2, 3), jnp.float32)
    out2 = simple_chess_net(x2, w1, b1, w2, b2)
    jax.block_until_ready(out2)
    assert out2.shape == (B2, 1)
    assert jnp.allclose(out2, ref_fn(x2), atol=1e-5, rtol=1e-5)

    print("KERNEL_OK")
</pallas_src>

<mosaic_0001>
module attributes {stable_mosaic.version = 11 : i64} {
  func.func @_mlp_kernel(%arg0: i32, %arg1: memref<3x128xf32, #tpu.memory_space<vmem>>, %arg2: memref<32x3xf32, #tpu.memory_space<vmem>>, %arg3: memref<32x1xf32, #tpu.memory_space<vmem>>, %arg4: memref<1x32xf32, #tpu.memory_space<vmem>>, %arg5: memref<1x1xf32, #tpu.memory_space<smem>>, %arg6: memref<1x128xf32, #tpu.memory_space<vmem>>) attributes {dimension_semantics = [#tpu.dimension_semantics<parallel>], iteration_bounds = array<i64: 1>, scalar_prefetch = 0 : i64, scratch_operands = 0 : i64, tpu.core_type = #tpu.core_type<tc>, window_params = [{transform_indices = @transform_0, window_bounds = array<i64: 3, 128>}, {pipeline_mode = #tpu.pipeline_mode<synchronous>, transform_indices = @transform_1, window_bounds = array<i64: 32, 3>}, {pipeline_mode = #tpu.pipeline_mode<synchronous>, transform_indices = @transform_2, window_bounds = array<i64: 32, 1>}, {pipeline_mode = #tpu.pipeline_mode<synchronous>, transform_indices = @transform_3, window_bounds = array<i64: 1, 32>}, {transform_indices = @transform_4, window_bounds = array<i64: 1, 1>}, {transform_indices = @transform_5, window_bounds = array<i64: 1, 128>}]} {
    %c0 = arith.constant 0 : index
    %c0_0 = arith.constant 0 : index
    %0 = vector.load %arg2[%c0, %c0_0] : memref<32x3xf32, #tpu.memory_space<vmem>>, vector<32x3xf32>
    %c0_1 = arith.constant 0 : index
    %c0_2 = arith.constant 0 : index
    %1 = vector.load %arg3[%c0_1, %c0_2] : memref<32x1xf32, #tpu.memory_space<vmem>>, vector<32x1xf32>
    %c0_3 = arith.constant 0 : index
    %c0_4 = arith.constant 0 : index
    %2 = vector.load %arg4[%c0_3, %c0_4] : memref<1x32xf32, #tpu.memory_space<vmem>>, vector<1x32xf32>
    %c0_5 = arith.constant 0 : index
    %c0_6 = arith.constant 0 : index
    %3 = memref.load %arg5[%c0_5, %c0_6] : memref<1x1xf32, #tpu.memory_space<smem>>
    %c0_i32 = arith.constant 0 : i32
    %4 = tpu.assume_multiple %c0_i32, 128 : i32
    %c0_7 = arith.constant 0 : index
    %5 = arith.index_cast %4 : i32 to index
    %6 = vector.load %arg1[%c0_7, %5] : memref<3x128xf32, #tpu.memory_space<vmem>>, vector<3x128xf32>
    %cst = arith.constant dense<0.000000e+00> : vector<32x128xf32>
    %7 = tpu.matmul %0, %6, %cst {dimension_numbers = #tpu.dot_dimension_numbers<[1], [0], [0], [1], [0, 0, 1, 1], [], []>, precision = #tpu.contract_precision<fp32>} : vector<32x3xf32>, vector<3x128xf32>, vector<32x128xf32> -> vector<32x128xf32>
    %8 = vector.broadcast %1 : vector<32x1xf32> to vector<32x128xf32>
    %9 = arith.addf %7, %8 : vector<32x128xf32>
    %cst_8 = arith.constant 0.000000e+00 : f32
    %10 = vector.broadcast %cst_8 : f32 to vector<32x128xf32>
    %11 = arith.maximumf %9, %10 : vector<32x128xf32>
    %cst_9 = arith.constant dense<0.000000e+00> : vector<1x128xf32>
    %12 = tpu.matmul %2, %11, %cst_9 {dimension_numbers = #tpu.dot_dimension_numbers<[1], [0], [0], [1], [0, 0, 1, 1], [], []>, precision = #tpu.contract_precision<fp32>} : vector<1x32xf32>, vector<32x128xf32>, vector<1x128xf32> -> vector<1x128xf32>
    %13 = vector.broadcast %3 : f32 to vector<1x128xf32>
    %14 = arith.addf %12, %13 : vector<1x128xf32>
    %c0_10 = arith.constant 0 : index
    %15 = arith.index_cast %4 : i32 to index
    %16 = vector.load %arg6[%c0_10, %15] : memref<1x128xf32, #tpu.memory_space<vmem>>, vector<1x128xf32>
    tpu.vector_store %arg6[%c0_10, %15], %14 {strides = array<i32>} : memref<1x128xf32, #tpu.memory_space<vmem>>, vector<1x128xf32>,
    return
  }
  func.func @transform_0(%arg0: i32) -> (i32, i32) {
    %c0_i32 = arith.constant 0 : i32
    %c0_i32_0 = arith.constant 0 : i32
    return %c0_i32, %arg0 : i32, i32
  }
  func.func @transform_1(%arg0: i32) -> (i32, i32) {
    %c0_i32 = arith.constant 0 : i32
    %c0_i32_0 = arith.constant 0 : i32
    %c0_i32_1 = arith.constant 0 : i32
    return %c0_i32, %c0_i32_0 : i32, i32
  }
  func.func @transform_2(%arg0: i32) -> (i32, i32) {
    %c0_i32 = arith.constant 0 : i32
    %c0_i32_0 = arith.constant 0 : i32
    %c0_i32_1 = arith.constant 0 : i32
    return %c0_i32, %c0_i32_0 : i32, i32
  }
  func.func @transform_3(%arg0: i32) -> (i32, i32) {
    %c0_i32 = arith.constant 0 : i32
    %c0_i32_0 = arith.constant 0 : i32
    %c0_i32_1 = arith.constant 0 : i32
    return %c0_i32, %c0_i32_0 : i32, i32
  }
  func.func @transform_4(%arg0: i32) -> (i32, i32) {
    %c0_i32 = arith.constant 0 : i32
    %c0_i32_0 = arith.constant 0 : i32
    %c0_i32_1 = arith.constant 0 : i32
    return %c0_i32, %c0_i32_0 : i32, i32
  }
  func.func @transform_5(%arg0: i32) -> (i32, i32) {
    %c0_i32 = arith.constant 0 : i32
    %c0_i32_0 = arith.constant 0 : i32
    return %c0_i32, %arg0 : i32, i32
  }
}

</mosaic_0001>

<bundles_post_ra>
// kernel: tpu_custom_call.1
= control target key start
LH: loop header
LB: loop body
LE: loop exit
PB: predicated region body
PF: predicated region fallthrough
CT: control target
= control target key end

     0   :  { %vm66_vm0 = vcmask 1042432   ;;  %vm53_vm1 = vcmask 23552   ;;  %v550_v4 = vmov 0   ;;  %s622_s0 = inlined_call_operand.vmem [shape: f32[3,8], index: 0, kind: input, shape index: {}]   ;;  %s623_s1 = inlined_call_operand.vmem [shape: f32[32,3], index: 1, kind: input, shape index: {}]   ;;  %s624_s2 = inlined_call_operand.vmem [shape: f32[32,1], index: 2, kind: input, shape index: {}]   ;;  %s625_s3 = inlined_call_operand.vmem [shape: f32[1,32], index: 3, kind: input, shape index: {}]   ;;  %s626_s4 = inlined_call_operand.<no memory space> [shape: f32[1,1], index: 4, kind: input, shape index: {}]   ;;  %s627_s5 = inlined_call_operand.hbm [shape: f32[1,8], index: 5, kind: output, shape index: {}]  }
   0x1   :  { %v32_v0 = vld [vmem:[%s622_s0] sm:$0x7]  ;;  %523 = vset.pattern.permute.xlu1 %v550_v4  ;;  %v27_v5 = vld [vmem:[%s624_s2 + $0x8] sm:$0xff]  ;;  %522 = vset.pattern.permute.xlu0 %v550_v4  ;;  %v24_v10 = vld [vmem:[%s623_s1 + $0x10] sm:$0xff] }
   0x2   :  { %v22_v1 = vld [vmem:[%s623_s1] sm:$0xff]  ;;  %v68_v2 = vsel %vm66_vm0, %v32_v0, 0  ;;  %v23_v6 = vld [vmem:[%s623_s1 + $0x8] sm:$0xff]  ;;  %40 = vperm.xlu1 %523, %v27_v5   ;;  %v29_v11 = vld [vmem:[%s624_s2 + $0x18] sm:$0xff] }
   0x3   :  { %v55_v3 = vsel %vm53_vm1, %v22_v1, 0  ;;  %v85_v7 = vand.u32 4294901760, %v68_v2  ;;  %v58_v9 = vsel %vm53_vm1, %v23_v6, 0  ;;  %50 = vperm.xlu0 %522, %v29_v11  }
   0x4   :  { %v87_v8 = vand.u32 4294901760, %v55_v3  ;;  %v95_v12 = vand.u32 4294901760, %v58_v9 }
   0x5   :  { %11 = vsyncpa [#allocation4], 0  ;;  %v136_v13 = vsub.f32 %v68_v2, %v85_v7  ;;  %86 = vmatpush.msra.mxu0 %v85_v7  ;;  %213 = vmatpush.msra.mxu3 %v85_v7  ;;  %v61_v16 = vsel %vm53_vm1, %v24_v10, 0  ;;  %v26_v19 = vld [vmem:[%s624_s2] sm:$0xff]  ;;  %v28_v24 = vld [vmem:[%s624_s2 + $0x10] sm:$0xff]  ;;  %vm314_vm2 = vcmask 261120  }
   0x6   :  { %v88_v14 = vsub.f32 %v55_v3, %v87_v8  ;;  %v96_v15 = vsub.f32 %v58_v9, %v95_v12  ;;  %v103_v23 = vand.u32 4294901760, %v61_v16  ;;  %v25_v27 = vld [vmem:[%s623_s1 + $0x18] sm:$0xff]  ;;  %s551_s11 = smov [#allocation3]   ;;  %s511_s15 = sshll.u32 %s627_s5, 4  ;;  %s512_s15 = int_to_ptr.hbm [resolvable:$true] %s511_s15 }
   0x7   :  { %175 = vmatpush.msra.mxu2 %v136_v13  ;;  %v137_v18 = vand.u32 4294901760, %v136_v13  ;;  %v64_v30 = vsel %vm53_vm1, %v25_v27, 0  ;;  %s509_s12 = sshll.u32 %s551_s11, 4  ;;  %s510_s12 = int_to_ptr.vmem [resolvable:$true] %s509_s12 }
   0x8   :  { %v89_v17 = vand.u32 4294901760, %v88_v14  ;;  %178 = vmatmul.f32.vlgmr.msra.gmra.mxu2 %v88_v14  ;;  %v97_v22 = vand.u32 4294901760, %v96_v15  ;;  %v104_v29 = vsub.f32 %v61_v16, %v103_v23  ;;  %v111_v33 = vand.u32 4294901760, %v64_v30 }
   0x9   :  { %v138_v21 = vsub.f32 %v136_v13, %v137_v18  ;;  %257 = vmatpush.msrb.mxu0 %v137_v18  ;;  %v30_v13 = vld [vmem:[%s625_s3] sm:$0x1] }
   0xa   :  { %v90_v20 = vsub.f32 %v88_v14, %v89_v17  ;;  %217 = vmatmul.f32.vlgmr.msra.gmra.mxu3 %v89_v17  ;;  %35 = vperm.xlu1 %523, %v26_v19   ;;  %v98_v28 = vsub.f32 %v96_v15, %v97_v22  ;;  %v105_v32 = vand.u32 4294901760, %v104_v29  ;;  %v112_v35 = vsub.f32 %v64_v30, %v111_v33 }
   0xb   :  { %v139_v26 = vand.u32 4294901760, %v138_v21  ;;  %45 = vperm.xlu0 %522, %v28_v24   ;;  %v316_v19 = vsel %vm314_vm2, %v30_v13, 0 }
   0xc   :  { %v91_v25 = vand.u32 4294901760, %v90_v20  ;;  %v99_v31 = vand.u32 4294901760, %v98_v28  ;;  %v106_v34 = vsub.f32 %v104_v29, %v105_v32  ;;  %v113_v37 = vand.u32 4294901760, %v112_v35 }
   0xd   :  { %140 = vmatpush.msra.mxu1 %v139_v26  ;;  %v338_v26 = vand.u32 4294901760, %v316_v19 }
   0xe   :  { %92 = vmatmul.f32.vlgmr.msra.gmra.mxu0 %v91_v25  ;;  %142 = vmatmul.f32.vlgmr.msra.gmra.mxu1 %v87_v8  ;;  %v107_v36 = vand.u32 4294901760, %v106_v34  ;;  %v114_v38 = vsub.f32 %v112_v35, %v113_v37 }
   0xf   :  { %291 = vmatpush.msrb.mxu1 %v85_v7  ;;  %v339_v34 = vsub.f32 %v316_v19, %v338_v26 }
  0x10   :  { %183 = vmatmul.f32.gmra.mxu2 %v96_v15  ;;  %v115_v39 = vand.u32 4294901760, %v114_v38 }
  0x12   :  { %223 = vmatmul.f32.gmra.mxu3 %v97_v22 }
  0x16   :  { %100 = vmatmul.f32.gmra.mxu0 %v99_v31  ;;  %146 = vmatmul.f32.gmra.mxu1 %v95_v12 }
  0x18   :  { %188 = vmatmul.f32.gmra.mxu2 %v104_v29 }
  0x1a   :  { %229 = vmatmul.f32.gmra.mxu3 %v105_v32 }
  0x1e   :  { %108 = vmatmul.f32.gmra.mxu0 %v107_v36  ;;  %150 = vmatmul.f32.gmra.mxu1 %v103_v23 }
  0x20   :  { %193 = vmatmul.f32.gmra.mxu2 %v112_v35 }
  0x22   :  { %235 = vmatmul.f32.gmra.mxu3 %v113_v37 }
  0x26   :  { %116 = vmatmul.f32.gmra.mxu0 %v115_v39  ;;  %154 = vmatmul.f32.gmra.mxu1 %v111_v33 }
  0x2e   :  { %259 = vmatmul.f32.vlgmr.msrb.gmra.mxu0 %v87_v8  ;;  %293 = vmatmul.f32.vlgmr.msrb.gmra.mxu1 %v87_v8 }
  0x36   :  { %263 = vmatmul.f32.gmra.mxu0 %v95_v12  ;;  %297 = vmatmul.f32.gmra.mxu1 %v95_v12 }
  0x3e   :  { %267 = vmatmul.f32.gmra.mxu0 %v103_v23  ;;  %301 = vmatmul.f32.gmra.mxu1 %v103_v23 }
  0x46   :  { %271 = vmatmul.f32.gmra.mxu0 %v111_v33  ;;  %305 = vmatmul.f32.gmra.mxu1 %v111_v33 }
  0x74   :  { %v41_v47 = vpop.permute.xlu1 %40 }
  0x75   :  { %v51_v48 = vpop.permute.xlu0 %50 }
  0x7c   :  { %v36_v53 = vpop.permute.xlu1 %35 }
  0x7d   :  { %v46_v54 = vpop.permute.xlu0 %45 }
  0x8b   :  { %v93_v40 = vpop.f32.mrf.mxu0  ;;  %v143_v41 = vpop.f32.mrf.mxu1 }
  0x8c   :  { %v179_v46 = vpop.f32.mrf.mxu2  ;;  %v94_v59 = vadd.f32 %v93_v40, %v36_v53  ;;  %v340_v40 = vand.u32 4294901760, %v339_v34 }
  0x8d   :  { %v218_v49 = vpop.f32.mrf.mxu3 }
  0x8e   :  { %v144_v62 = vadd.f32 %v143_v41, %v94_v59 }
  0x90   :  { %v180_v4 = vadd.f32 %v179_v46, %v144_v62  ;;  %v341_v46 = vsub.f32 %v339_v34, %v340_v40 }
  0x92   :  { %v219_v9 = vadd.f32 %v218_v49, %v180_v4 }
  0x93   :  { %v101_v42 = vpop.f32.mrf.mxu0  ;;  %v147_v43 = vpop.f32.mrf.mxu1 }
  0x94   :  { %v184_v52 = vpop.f32.mrf.mxu2  ;;  %v102_v57 = vadd.f32 %v101_v42, %v41_v47 }
  0x95   :  { %v224_v55 = vpop.f32.mrf.mxu3 }
  0x96   :  { %v148_v61 = vadd.f32 %v147_v43, %v102_v57 }
  0x98   :  { %v185_v2 = vadd.f32 %v184_v52, %v148_v61 }
  0x9a   :  { %v225_v8 = vadd.f32 %v224_v55, %v185_v2 }
  0x9b   :  { %v109_v44 = vpop.f32.mrf.mxu0  ;;  %v151_v45 = vpop.f32.mrf.mxu1 }
  0x9c   :  { %v110_v60 = vadd.f32 %v109_v44, %v46_v54  ;;  %v189_v63 = vpop.f32.mrf.mxu2 }
  0x9d   :  { %v230_v5 = vpop.f32.mrf.mxu3 }
  0x9e   :  { %v152_v0 = vadd.f32 %v151_v45, %v110_v60  ;;  %v313_v60 = vstv %s626_s4 }
  0xa0   :  { %v190_v6 = vadd.f32 %v189_v63, %v152_v0 }
  0xa2   :  { %v231_v10 = vadd.f32 %v230_v5, %v190_v6 }
  0xa3   :  { %v117_v50 = vpop.f32.mrf.mxu0  ;;  %v155_v51 = vpop.f32.mrf.mxu1 }
  0xa4   :  { %v118_v7 = vadd.f32 %v117_v50, %v51_v48  ;;  %v194_v14 = vpop.f32.mrf.mxu2 }
  0xa5   :  { %v236_v23 = vpop.f32.mrf.mxu3 }
  0xa6   :  { %v156_v11 = vadd.f32 %v155_v51, %v118_v7  ;;  %v342_v51 = vand.u32 4294901760, %v341_v46 }
  0xa8   :  { %v195_v20 = vadd.f32 %v194_v14, %v156_v11 }
  0xaa   :  { %v237_v27 = vadd.f32 %v236_v23, %v195_v20 }
  0xab   :  { %v260_v56 = vpop.f32.mrf.mxu0  ;;  %v294_v58 = vpop.f32.mrf.mxu1 }
  0xac   :  { %v261_v16 = vadd.f32 %v260_v56, %v219_v9 }
  0xae   :  { %v295_v24 = vadd.f32 %v294_v58, %v261_v16 }
  0xb0   :  { %v309_v30 = vmax.f32 %v295_v24, 0.0 }
  0xb2   :  { %v336_v37 = vand.u32 4294901760, %v309_v30 }
  0xb3   :  { %v264_v1 = vpop.f32.mrf.mxu0  ;;  %v298_v3 = vpop.f32.mrf.mxu1 }
  0xb4   :  { %v265_v12 = vadd.f32 %v264_v1, %v225_v8  ;;  %v378_v43 = vsub.f32 %v309_v30, %v336_v37 }
  0xb6   :  { %v299_v21 = vadd.f32 %v298_v3, %v265_v12  ;;  %v379_v52 = vand.u32 4294901760, %v378_v43 }
  0xb8   :  { %v310_v28 = vmax.f32 %v299_v21, 0.0  ;;  %v380_v56 = vsub.f32 %v378_v43, %v379_v52 }
  0xba   :  { %v334_v35 = vand.u32 4294901760, %v310_v28  ;;  %v381_v58 = vand.u32 4294901760, %v380_v56 }
  0xbb   :  { %v268_v15 = vpop.f32.mrf.mxu0  ;;  %v302_v18 = vpop.f32.mrf.mxu1 }
  0xbc   :  { %v269_v17 = vadd.f32 %v268_v15, %v231_v10  ;;  %v372_v41 = vsub.f32 %v310_v28, %v334_v35 }
  0xbe   :  { %v303_v22 = vadd.f32 %v302_v18, %v269_v17  ;;  %v373_v48 = vand.u32 4294901760, %v372_v41 }
  0xc0   :  { %v311_v25 = vmax.f32 %v303_v22, 0.0  ;;  %v374_v54 = vsub.f32 %v372_v41, %v373_v48 }
  0xc2   :  { %v332_v31 = vand.u32 4294901760, %v311_v25  ;;  %v375_v57 = vand.u32 4294901760, %v374_v54 }
  0xc3   :  { %v272_v29 = vpop.f32.mrf.mxu0  ;;  %v306_v33 = vpop.f32.mrf.mxu1 }
  0xc4   :  { %v273_v32 = vadd.f32 %v272_v29, %v237_v27  ;;  %v366_v38 = vsub.f32 %v311_v25, %v332_v31 }
  0xc6   :  { %v307_v36 = vadd.f32 %v306_v33, %v273_v32  ;;  %v367_v45 = vand.u32 4294901760, %v366_v38 }
  0xc8   :  { %v312_v39 = vmax.f32 %v307_v36, 0.0  ;;  %v368_v50 = vsub.f32 %v366_v38, %v367_v45 }
  0xca   :  { %v330_v42 = vand.u32 4294901760, %v312_v39  ;;  %v369_v55 = vand.u32 4294901760, %v368_v50 }
  0xcc   :  { %v360_v44 = vsub.f32 %v312_v39, %v330_v42  ;;  %331 = vmatpush.msrb.mxu2 %v330_v42 }
  0xce   :  { %333 = vmatpush.msrb.mxu2 %v332_v31  ;;  %v361_v47 = vand.u32 4294901760, %v360_v44 }
  0xd0   :  { %335 = vmatpush.msrb.mxu2 %v334_v35  ;;  %v362_v49 = vsub.f32 %v360_v44, %v361_v47 }
  0xd2   :  { %337 = vmatpush.msrb.mxu2 %v336_v37  ;;  %v363_v53 = vand.u32 4294901760, %v362_v49 }
  0xd3   :  { %343 = vmatmul.f32.vlgmr.msrb.gmra.mxu2 %v342_v51 }
  0xd4   :  { %402 = vmatpush.msra.mxu2 %v360_v44  ;;  %364 = vmatpush.msrb.mxu3 %v363_v53 }
  0xd6   :  { %405 = vmatpush.msra.mxu2 %v366_v38  ;;  %370 = vmatpush.msrb.mxu3 %v369_v55 }
  0xd8   :  { %408 = vmatpush.msra.mxu2 %v372_v41  ;;  %376 = vmatpush.msrb.mxu3 %v375_v57 }
  0xda   :  { %411 = vmatpush.msra.mxu2 %v378_v43  ;;  %382 = vmatpush.msrb.mxu3 %v381_v58 }
  0xdb   :  { %384 = vmatmul.f32.vlgmr.msrb.gmra.mxu3 %v338_v26  ;;  %414 = vmatmul.f32.vlgmr.msra.gmra.mxu2 %v339_v34 }
  0xdc   :  { %460 = vmatpush.msrb.mxu2 %v361_v47  ;;  %431 = vmatpush.msra.mxu3 %v330_v42 }
  0xde   :  { %464 = vmatpush.msrb.mxu2 %v367_v45  ;;  %433 = vmatpush.msra.mxu3 %v332_v31 }
  0xe0   :  { %468 = vmatpush.msrb.mxu2 %v373_v48  ;;  %435 = vmatpush.msra.mxu3 %v334_v35 }
  0xe2   :  { %472 = vmatpush.msrb.mxu2 %v379_v52  ;;  %437 = vmatpush.msra.mxu3 %v336_v37 }
  0xe3   :  { %441 = vmatmul.f32.vlgmr.msra.gmra.mxu3 %v340_v40  ;;  %474 = vmatmul.f32.vlgmr.msrb.gmra.mxu2 %v338_v26 }
  0xe4   :  { %491 = vmatpush.msrb.mxu3 %v330_v42 }
  0xe6   :  { %493 = vmatpush.msrb.mxu3 %v332_v31 }
  0xe8   :  { %495 = vmatpush.msrb.mxu3 %v334_v35 }
  0xea   :  { %497 = vmatpush.msrb.mxu3 %v336_v37 }
  0xeb   :  { %499 = vmatmul.f32.vlgmr.msrb.gmra.mxu3 %v338_v26 }
 0x156   :  { %v344_v59 = vpop.f32.mrf.mxu2 }
 0x157   :  { %v345_v62 = vadd.f32 %v344_v59, %v313_v60 }
 0x15e   :  { %v385_v61 = vpop.f32.mrf.mxu3  ;;  %v415_v63 = vpop.f32.mrf.mxu2 }
 0x15f   :  { %v386_v0 = vadd.f32 %v385_v61, %v345_v62 }
 0x161   :  { %v416_v2 = vadd.f32 %v415_v63, %v386_v0 }
 0x166   :  { %v442_v1 = vpop.f32.mrf.mxu3  ;;  %v475_v4 = vpop.f32.mrf.mxu2 }
 0x167   :  { %v443_v3 = vadd.f32 %v442_v1, %v416_v2 }
 0x169   :  { %v476_v5 = vadd.f32 %v475_v4, %v443_v3 }
 0x16e   :  { %v500_v6 = vpop.f32.mrf.mxu3 }
 0x16f   :  { %v501_v7 = vadd.f32 %v500_v6, %v476_v5 }
 0x171   :  { %503 = vst [vmem:[#allocation3] sm:$0x1] %v501_v7 }
 0x172   :  { %514 = dma.vmem_to_hbm [thread:$0]  %s510_s12, 16, %s512_s15, [#allocation4]  }
 0x173   :  { %548 = dma.done.wait [#allocation4], 16  }
 0x174   :  { %549 = vsyncadd [#allocation4], 4294967280 }
 0x175   :  { %519 = vsyncpa [#allocation4], 1 }

</bundles_post_ra>
